<compile_context>
chip_gen: v6e
topology: v6e:2x2x1
jax: 0.10.0
libtpu: 0.0.40
codegen_flags: <defaults>
</compile_context>

<pallas_src>
import jax
import jax.numpy as jnp
from jax.experimental import pallas as pl
from jax.experimental.pallas import tpu as pltpu


# ---------------------------------------------------------------------------
# One-time (weight-load-time) kernel: build the (V, V) bigram logits table.
# ---------------------------------------------------------------------------
def _build_table_kernel(emb_ref, wt_ref, b_ref, table_ref):
    """table[v, :] = emb[v, :] @ W^T + bias, as (V,E) @ (E,V) + (1,V)."""
    table_ref[...] = (
        jnp.dot(emb_ref[...], wt_ref[...], preferred_element_type=jnp.float32)
        + b_ref[...]
    )


def precompute_bigram_table(emb_table, lin_weight, lin_bias):
    """Run ONCE at weight-load time.  Not part of the per-call hot path.

    emb_table:  (V, E) f32  nn.Embedding weight
    lin_weight: (V, E) f32  nn.Linear weight (PyTorch layout)
    lin_bias:   (V,)   f32  nn.Linear bias
    returns:    (V, V) f32  bigram logits table
    """
    V, E = emb_table.shape
    # One-time transpose outside the hot path -> canonical contraction in-kernel.
    w_t = jnp.transpose(lin_weight).astype(jnp.float32)     # (E, V)
    b_row = lin_bias.reshape(1, V).astype(jnp.float32)

    ce = pl.CostEstimate(
        flops=2 * V * V * E,
        transcendentals=0,
        bytes_accessed=(V * E * 4) * 2 + V * 4 + V * V * 4,
    )
    return pl.pallas_call(
        _build_table_kernel,
        out_shape=jax.ShapeDtypeStruct((V, V), jnp.float32),
        in_specs=[
            pl.BlockSpec((V, E), lambda: (0, 0)),
            pl.BlockSpec((E, V), lambda: (0, 0)),
            pl.BlockSpec((1, V), lambda: (0, 0)),
        ],
        out_specs=pl.BlockSpec((V, V), lambda: (0, 0)),
        cost_estimate=ce,
    )(emb_table.astype(jnp.float32), w_t, b_row)


# ---------------------------------------------------------------------------
# Per-call hot-path kernel: pure row gather of the precomputed table.
# ---------------------------------------------------------------------------
def _gather_rows_kernel(tok_ref, table_ref, out_ref):
    """out[r, :] = table[tok[i*TM + r], :] for the TM rows of this grid step.

    tok_ref:   (Mp,) int32 in SMEM (scalar prefetch)
    table_ref: (V, V) f32, VMEM-resident (constant index_map -> fetched once)
    out_ref:   (TM, V) f32 output block (sublane/lane aligned)
    """
    i = pl.program_id(0)
    tm = out_ref.shape[0]
    v = table_ref.shape[0]
    base = i * tm
    for r in range(tm):  # small static unroll
        tok = tok_ref[base + r]
        tok = jnp.clip(tok, 0, v - 1)  # guard against OOB VMEM reads
        out_ref[pl.ds(r, 1), :] = table_ref[pl.ds(tok, 1), :]


def bigram_forward(tokens, table, *, tm=8):
    """Hot-path forward: logits[b, t, :] = table[tokens[b, t], :].

    tokens: (B, T) int32
    table:  (V, V) f32 precomputed bigram table
    returns (B, T, V) f32 logits
    """
    B, T = tokens.shape
    V = table.shape[0]
    M = B * T
    Mp = ((M + tm - 1) // tm) * tm  # pad row count to a multiple of the tile

    tok_flat = tokens.reshape(M).astype(jnp.int32)
    if Mp != M:
        tok_flat = jnp.pad(tok_flat, (0, Mp - M))

    ce = pl.CostEstimate(
        flops=0,
        transcendentals=0,
        bytes_accessed=V * V * 4 + Mp * V * 4 + Mp * 4,
    )

    out = pl.pallas_call(
        _gather_rows_kernel,
        out_shape=jax.ShapeDtypeStruct((Mp, V), jnp.float32),
        grid_spec=pltpu.PrefetchScalarGridSpec(
            num_scalar_prefetch=1,          # tok_flat -> SMEM, visible to index_maps
            grid=(Mp // tm,),
            in_specs=[
                # Constant block index: the table is DMA'd once and stays VMEM-resident
                # across all grid steps.
                pl.BlockSpec((V, V), lambda i, tok: (0, 0)),
            ],
            out_specs=pl.BlockSpec((tm, V), lambda i, tok: (i, 0)),
        ),
        compiler_params=pltpu.CompilerParams(
            # Lets v7x's two TensorCores split the row tiles; no-op on v5e/v6e.
            dimension_semantics=("parallel",),
        ),
        cost_estimate=ce,
    )(tok_flat, table)

    return out[:M].reshape(B, T, V)


if __name__ == "__main__":
    # Small, TPU-friendly config (vocab = 128 lanes, B*T multiple of 8 sublanes).
    vocab_size = 128
    embed_dim = 32
    batch = 8
    seq = 2  # "bigram": input is (B, 2) tokens

    key = jax.random.PRNGKey(0)
    k_emb, k_lin, k_tok = jax.random.split(key, 3)

    # Deterministic init matching _init_weights: N(0, 0.02) weights, zero bias.
    emb_table = 0.02 * jax.random.normal(k_emb, (vocab_size, embed_dim), dtype=jnp.float32)
    lin_weight = 0.02 * jax.random.normal(k_lin, (vocab_size, embed_dim), dtype=jnp.float32)
    lin_bias = jnp.zeros((vocab_size,), dtype=jnp.float32)

    tokens = jax.random.randint(k_tok, (batch, seq), 0, vocab_size, dtype=jnp.int32)

    # One-time (weight-load-time) table build, then the per-call gather forward.
    table = precompute_bigram_table(emb_table, lin_weight, lin_bias)
    jax.block_until_ready(table)

    logits = bigram_forward(tokens, table)
    jax.block_until_ready(logits)

    # Pure-JAX reference (same math as the PyTorch module in eval mode).
    ref = jnp.take(emb_table, tokens, axis=0) @ lin_weight.T + lin_bias
    assert logits.shape == (batch, seq, vocab_size)
    assert jnp.allclose(logits, ref, atol=1e-5, rtol=1e-5)

    print("KERNEL_OK")
</pallas_src>

<mosaic_0001>
module attributes {stable_mosaic.version = 11 : i64} {
  func.func @_build_table_kernel(%arg0: memref<128x32xf32, #tpu.memory_space<vmem>>, %arg1: memref<32x128xf32, #tpu.memory_space<vmem>>, %arg2: memref<1x128xf32, #tpu.memory_space<vmem>>, %arg3: memref<128x128xf32, #tpu.memory_space<vmem>>) attributes {dimension_semantics = [], scalar_prefetch = 0 : i64, scratch_operands = 0 : i64, tpu.core_type = #tpu.core_type<tc>} {
    %c0 = arith.constant 0 : index
    %c0_0 = arith.constant 0 : index
    %0 = vector.load %arg0[%c0, %c0_0] : memref<128x32xf32, #tpu.memory_space<vmem>>, vector<128x32xf32>
    %c0_1 = arith.constant 0 : index
    %c0_2 = arith.constant 0 : index
    %1 = vector.load %arg1[%c0_1, %c0_2] : memref<32x128xf32, #tpu.memory_space<vmem>>, vector<32x128xf32>
    %cst = arith.constant dense<0.000000e+00> : vector<128x128xf32>
    %2 = tpu.matmul %0, %1, %cst {dimension_numbers = #tpu.dot_dimension_numbers<[1], [0], [0], [1], [0, 0, 1, 1], [], []>} : vector<128x32xf32>, vector<32x128xf32>, vector<128x128xf32> -> vector<128x128xf32>
    %c0_3 = arith.constant 0 : index
    %c0_4 = arith.constant 0 : index
    %3 = vector.load %arg2[%c0_3, %c0_4] : memref<1x128xf32, #tpu.memory_space<vmem>>, vector<1x128xf32>
    %4 = vector.broadcast %3 : vector<1x128xf32> to vector<128x128xf32>
    %5 = arith.addf %2, %4 : vector<128x128xf32>
    %c0_5 = arith.constant 0 : index
    %c0_6 = arith.constant 0 : index
    %6 = vector.load %arg3[%c0_5, %c0_6] : memref<128x128xf32, #tpu.memory_space<vmem>>, vector<128x128xf32>
    tpu.vector_store %arg3[%c0_5, %c0_6], %5 {strides = array<i32>} : memref<128x128xf32, #tpu.memory_space<vmem>>, vector<128x128xf32>,
    return
  }
}

</mosaic_0001>

<bundles_post_ra>
// kernel: tpu_custom_call.1
= control target key start
LH: loop header
LB: loop body
LE: loop exit
PB: predicated region body
PF: predicated region fallthrough
CT: control target
= control target key end

     0   :  { %vm42_vm0 = vcmask 261120   ;;  %s475_s0 = inlined_call_operand.vmem [shape: f32[128,32], index: 0, kind: input, shape index: {}]   ;;  %s476_s1 = inlined_call_operand.vmem [shape: f32[32,128], index: 1, kind: input, shape index: {}]   ;;  %s477_s2 = inlined_call_operand.vmem [shape: f32[1,128], index: 2, kind: input, shape index: {}]   ;;  %s478_s3 = inlined_call_operand.hbm [shape: f32[128,128], index: 3, kind: output, shape index: {}]  }
   0x1   :  { %v34_v0 = vld [vmem:[%s476_s1 + $0x18] sm:$0xff]  ;;  %v33_v1 = vld [vmem:[%s476_s1 + $0x10] sm:$0xff]  ;;  %v32_v2 = vld [vmem:[%s476_s1 + $0x8] sm:$0xff] }
   0x2   :  { %305 = vmatprep.subr.mxu0 %v34_v0  ;;  %337 = vmatprep.subr.mxu1 %v34_v0  ;;  %v31_v3 = vld [vmem:[%s476_s1] sm:$0xff] }
   0x3   :  { %306 = vmatpush3.msra.mxu0 %v34_v0  ;;  %341 = vmatpush3.msra.mxu1 %v34_v0  ;;  %v15_v4 = vld [vmem:[%s475_s0] sm:$0xff] }
   0x4   :  { %307 = vmatprep.subr.mxu0 %v33_v1  ;;  %338 = vmatprep.subr.mxu1 %v33_v1  ;;  %v23_v5 = vld [vmem:[%s475_s0 + $0x40] sm:$0xff] }
   0x5   :  { %308 = vmatpush3.msra.mxu0 %v33_v1  ;;  %342 = vmatpush3.msra.mxu1 %v33_v1 }
   0x6   :  { %309 = vmatprep.subr.mxu0 %v32_v2  ;;  %339 = vmatprep.subr.mxu1 %v32_v2 }
   0x7   :  { %310 = vmatpush3.msra.mxu0 %v32_v2  ;;  %343 = vmatpush3.msra.mxu1 %v32_v2 }
   0x8   :  { %8 = vsyncpa [#allocation3], 0  ;;  %311 = vmatprep.subr.mxu0 %v31_v3  ;;  %340 = vmatprep.subr.mxu1 %v31_v3  ;;  %v16_v6 = vld [vmem:[%s475_s0 + $0x8] sm:$0xff]  ;;  %v17_v8 = vld [vmem:[%s475_s0 + $0x10] sm:$0xff] }
   0x9   :  { %v24_v7 = vld [vmem:[%s475_s0 + $0x48] sm:$0xff]  ;;  %312 = vmatpush3.msra.mxu0 %v31_v3  ;;  %344 = vmatpush3.msra.mxu1 %v31_v3  ;;  %v25_v9 = vld [vmem:[%s475_s0 + $0x50] sm:$0xff]  ;;  %v18_v10 = vld [vmem:[%s475_s0 + $0x18] sm:$0xff] }
   0xa   :  { %313 = vmatprep.mubr.msk.f32.mxu0 %vm42_vm0, %v15_v4  ;;  %325 = vmatprep.mubr.msk.f32.mxu1 %vm42_vm0, %v23_v5  ;;  %v26_v11 = vld [vmem:[%s475_s0 + $0x58] sm:$0xff]  ;;  %v19_v12 = vld [vmem:[%s475_s0 + $0x20] sm:$0xff]  ;;  %v20_v14 = vld [vmem:[%s475_s0 + $0x28] sm:$0xff] }
   0xb   :  { %314 = vmatmul.mubr.msk.f32.vlgmr.msra.gmra.mxu0 %vm42_vm0, %v16_v6  ;;  %326 = vmatmul.mubr.msk.f32.vlgmr.msra.gmra.mxu1 %vm42_vm0, %v24_v7  ;;  %v27_v13 = vld [vmem:[%s475_s0 + $0x60] sm:$0xff]  ;;  %v28_v15 = vld [vmem:[%s475_s0 + $0x68] sm:$0xff]  ;;  %v21_v16 = vld [vmem:[%s475_s0 + $0x30] sm:$0xff] }
   0xc   :  { %316 = vmatprep.mubr.msk.f32.mxu0 %vm42_vm0, %v17_v8  ;;  %328 = vmatprep.mubr.msk.f32.mxu1 %vm42_vm0, %v25_v9  ;;  %v29_v17 = vld [vmem:[%s475_s0 + $0x70] sm:$0xff]  ;;  %v22_v18 = vld [vmem:[%s475_s0 + $0x38] sm:$0xff]  ;;  %v268_v20 = vld [vmem:[%s477_s2] ss:$0 sm:$0xff] }
   0xd   :  { %v30_v19 = vld [vmem:[%s475_s0 + $0x78] sm:$0xff]  ;;  %s370_s0 = smov [#allocation2]  }
   0xe   :  { %s257_s2 = sshll.u32 %s370_s0, 4  ;;  %s258_s2 = int_to_ptr.vmem [resolvable:$true] %s257_s2 }
   0xf   :  { %317 = vmatmul.mubr.msk.f32.gmra.mxu0 %vm42_vm0, %v18_v10  ;;  %329 = vmatmul.mubr.msk.f32.gmra.mxu1 %vm42_vm0, %v26_v11  ;;  %s348_s1 = scalar_lea.vmem %s258_s2, 2048  ;;  %p353_p1 = scmp.lt.s32.totalorder %s258_s2, %s258_s2 }
  0x10   :  { %319 = vmatprep.mubr.msk.f32.mxu0 %vm42_vm0, %v19_v12  ;;  %331 = vmatprep.mubr.msk.f32.mxu1 %vm42_vm0, %v27_v13  ;;  %p349_p0 = scmp.ne.s32.totalorder %s258_s2, %s348_s1  ;;  %p354_p2 = scmp.lt.s32.totalorder %s348_s1, %s348_s1 }
  0x12   :  { %p355_p3 = por %p354_p2, %p353_p1 }
  0x13   :  { %320 = vmatmul.mubr.msk.f32.gmra.mxu0 %vm42_vm0, %v20_v14  ;;  %332 = vmatmul.mubr.msk.f32.gmra.mxu1 %vm42_vm0, %v28_v15 }
  0x14   :  { %322 = vmatprep.mubr.msk.f32.mxu0 %vm42_vm0, %v21_v16  ;;  %334 = vmatprep.mubr.msk.f32.mxu1 %vm42_vm0, %v29_v17  ;;  %p356_p4 = pnand %p355_p3, %p349_p0 }
  0x17   :  { %323 = vmatmul.mubr.msk.f32.gmra.mxu0 %vm42_vm0, %v22_v18  ;;  %335 = vmatmul.mubr.msk.f32.gmra.mxu1 %vm42_vm0, %v30_v19 }
  0xcb   :  { %v315_v21 = vpop.f32.mrf.mxu0  ;;  %v327_v22 = vpop.f32.mrf.mxu1 }
  0xcc   :  { %v163_v23 = vadd.f32 %v315_v21, %v268_v20  ;;  %v203_v24 = vadd.f32 %v327_v22, %v268_v20 }
  0xcd   :  { %v157_v25 = vpop.f32.mrf.mxu0  ;;  %v197_v26 = vpop.f32.mrf.mxu1 }
  0xce   :  { %237 = vst [vmem:[#allocation2 + $0x8] sm:$0xff] %v163_v23  ;;  %245 = vst [vmem:[#allocation2 + $0x48] sm:$0xff] %v203_v24  ;;  %v158_v27 = vadd.f32 %v268_v20, %v157_v25  ;;  %v198_v28 = vadd.f32 %v268_v20, %v197_v26 }
  0xcf   :  { %v318_v29 = vpop.f32.mrf.mxu0  ;;  %v330_v30 = vpop.f32.mrf.mxu1 }
  0xd0   :  { %236 = vst [vmem:[#allocation2] sm:$0xff] %v158_v27  ;;  %244 = vst [vmem:[#allocation2 + $0x40] sm:$0xff] %v198_v28  ;;  %v173_v31 = vadd.f32 %v318_v29, %v268_v20  ;;  %v213_v32 = vadd.f32 %v330_v30, %v268_v20 }
  0xd1   :  { %v167_v33 = vpop.f32.mrf.mxu0  ;;  %v207_v34 = vpop.f32.mrf.mxu1 }
  0xd2   :  { %239 = vst [vmem:[#allocation2 + $0x18] sm:$0xff] %v173_v31  ;;  %247 = vst [vmem:[#allocation2 + $0x58] sm:$0xff] %v213_v32  ;;  %v168_v35 = vadd.f32 %v268_v20, %v167_v33  ;;  %v208_v36 = vadd.f32 %v268_v20, %v207_v34 }
  0xd3   :  { %v321_v37 = vpop.f32.mrf.mxu0  ;;  %v333_v38 = vpop.f32.mrf.mxu1 }
  0xd4   :  { %238 = vst [vmem:[#allocation2 + $0x10] sm:$0xff] %v168_v35  ;;  %246 = vst [vmem:[#allocation2 + $0x50] sm:$0xff] %v208_v36  ;;  %v183_v39 = vadd.f32 %v321_v37, %v268_v20  ;;  %v223_v40 = vadd.f32 %v333_v38, %v268_v20 }
  0xd5   :  { %v177_v41 = vpop.f32.mrf.mxu0  ;;  %v217_v42 = vpop.f32.mrf.mxu1 }
  0xd6   :  { %241 = vst [vmem:[#allocation2 + $0x28] sm:$0xff] %v183_v39  ;;  %249 = vst [vmem:[#allocation2 + $0x68] sm:$0xff] %v223_v40  ;;  %v178_v43 = vadd.f32 %v268_v20, %v177_v41  ;;  %v218_v44 = vadd.f32 %v268_v20, %v217_v42 }
  0xd7   :  { %v324_v45 = vpop.f32.mrf.mxu0  ;;  %v336_v46 = vpop.f32.mrf.mxu1 }
  0xd8   :  { %240 = vst [vmem:[#allocation2 + $0x20] sm:$0xff] %v178_v43  ;;  %248 = vst [vmem:[#allocation2 + $0x60] sm:$0xff] %v218_v44  ;;  %v193_v47 = vadd.f32 %v324_v45, %v268_v20  ;;  %v233_v48 = vadd.f32 %v336_v46, %v268_v20 }
  0xd9   :  { %v187_v49 = vpop.f32.mrf.mxu0  ;;  %v227_v50 = vpop.f32.mrf.mxu1 }
  0xda   :  { %243 = vst [vmem:[#allocation2 + $0x38] sm:$0xff] %v193_v47  ;;  %251 = vst [vmem:[#allocation2 + $0x78] sm:$0xff] %v233_v48  ;;  %v188_v51 = vadd.f32 %v268_v20, %v187_v49  ;;  %v228_v52 = vadd.f32 %v268_v20, %v227_v50 }
  0xdc   :  { %242 = vst [vmem:[#allocation2 + $0x30] sm:$0xff] %v188_v51  ;;  %250 = vst [vmem:[#allocation2 + $0x70] sm:$0xff] %v228_v52 }
  0xdd   :  { %359 = shalt.err (!%p356_p4)
}
  0xde   :  { %s371_s26 = smov 128   ;;  %s372_s27 = smov 8  }
  0xdf   :  { %263 = dma.vmem_to_hbm [thread:$0]  %s258_s2, 2048, %s478_s3, [#allocation3], %s371_s26, %s371_s26, %s372_s27  }
  0xe0   :  { %368 = dma.done.wait [#allocation3], 2048  }
  0xe1   :  { %369 = vsyncadd [#allocation3], 4294965248 }
  0xe2   :  { %267 = vsyncpa [#allocation3], 1 }

</bundles_post_ra>
